<compile_context>
chip_gen: v7x
topology: tpu7x:2x2x1
jax: 0.10.0
libtpu: 0.0.40
codegen_flags: <defaults>
</compile_context>

<pallas_src>
import functools

import jax
import jax.numpy as jnp
from jax import lax
from jax.experimental import pallas as pl
from jax.experimental.pallas import tpu as pltpu

_EPS = 1e-12          # F.normalize default eps (clamp on the L2 norm)
_EPS2 = _EPS * _EPS   # equivalent clamp on the sum of squares (still normal f32)


def _normed_linear_kernel(x_ref, w_ref, xs_ref, ws_ref, o_ref):
    """One (tm, tn) f32 output tile, accumulated in-place over the k axis.

    NOTE: correctness relies on k (the contraction axis) being the innermost,
    sequentially iterated ("arbitrary") grid axis: the output block is then
    resident in VMEM across k, so we can accumulate directly into o_ref and
    normalize on the last k step.  Do not reorder or mark k "parallel".
    """
    k = pl.program_id(2)

    @pl.when(k == 0)
    def _init():
        o_ref[...] = jnp.zeros_like(o_ref)

    # MXU: bf16 inputs, f32 accumulation directly into the resident out block.
    o_ref[...] += jnp.dot(x_ref[...], w_ref[...],
                          preferred_element_type=jnp.float32)

    @pl.when(k == pl.num_programs(2) - 1)
    def _finalize():
        # Sums-of-squares were precomputed in f32 in the wrapper (hoisted out
        # of the k loop); rsqrt goes to the EUP slot, scaling is O(tm*tn).
        row_scale = lax.rsqrt(jnp.maximum(xs_ref[...], _EPS2))  # (tm, 1)
        col_scale = lax.rsqrt(jnp.maximum(ws_ref[...], _EPS2))  # (1, tn)
        o_ref[...] = o_ref[...] * row_scale * col_scale


def _round_up(a, b):
    return (a + b - 1) // b * b


def _vmem_capacity_bytes():
    """Physical VMEM per TensorCore; falls back to the v7x (smallest) value."""
    try:
        info = pltpu.get_tpu_info()
        for name in ("vmem_capacity_bytes", "vmem_bytes", "vmem_size_bytes"):
            v = getattr(info, name, None)
            if v:
                return int(v)
    except Exception:
        pass
    return 64 * 1024 * 1024


@functools.partial(jax.jit, static_argnames=("tm", "tn", "tk", "w_buffers"))
def normed_linear(x, weight, *, tm=None, tn=None, tk=None, w_buffers=None):
    """out = F.normalize(x, dim=1) @ F.normalize(weight, dim=0)."""
    n, d = x.shape
    d2, m = weight.shape
    assert d == d2, "in_features mismatch"

    # Generation-aware VMEM budget: ~96 MiB on v5e/v6e (128 MiB physical),
    # ~48 MiB on v7x (64 MiB physical).
    vmem_cap = _vmem_capacity_bytes()
    big_vmem = vmem_cap >= 128 * 1024 * 1024
    vmem_limit = min(vmem_cap * 3 // 4, 96 * 1024 * 1024)

    auto_tiles = tm is None and tn is None and tk is None

    # Defaults: tn/tk multiples of 256 (fill the 2x256x256 MXU on v6e/v7x).
    # Footprint with tm=512, tn=1024, tk=2048 bf16 (double-buffered inputs +
    # resident f32 out block) is ~20 MiB -- well inside both budgets.
    if tm is None:
        tm = min(512, _round_up(n, 16))
    if tn is None:
        tn = min(1024, _round_up(m, 256))
    if tk is None:
        tk = min(2048 if big_vmem else 1024, _round_up(d, 256))
    assert tm % 16 == 0, "tm must be a multiple of 16 (bf16 sublane packing)"
    assert tn % 128 == 0 and tk % 128 == 0

    # Keep both v7x TensorCores busy: if the parallel grid would be 1x1,
    # shrink a parallel tile so grid_i*grid_j >= 2 (cheap on 1-TC chips too).
    if auto_tiles and (_round_up(n, tm) // tm) * (_round_up(m, tn) // tn) == 1:
        if tn % 256 == 0:
            tn //= 2
        elif tm % 32 == 0:
            tm //= 2

    n_pad = _round_up(n, tm)
    m_pad = _round_up(m, tn)
    d_pad = _round_up(d, tk)

    # Row / column sums-of-squares in full f32 (exact F.normalize parity),
    # computed ONCE here instead of per (i, j) output tile in the kernel.
    x32 = x.astype(jnp.float32)
    w32 = weight.astype(jnp.float32)
    xs = jnp.sum(x32 * x32, axis=1, keepdims=True)   # (n, 1)
    ws = jnp.sum(w32 * w32, axis=0, keepdims=True)   # (1, m)

    # bf16 operands for the MXU (norms above already captured in f32).
    # Cast + pad are adjacent element-wise/pad ops under the same jit, so XLA
    # fuses them into a single HBM pass over x / w.
    xb = x.astype(jnp.bfloat16)
    wb = weight.astype(jnp.bfloat16)
    if (n_pad, d_pad) != (n, d):
        xb = jnp.pad(xb, ((0, n_pad - n), (0, d_pad - d)))
    if (d_pad, m_pad) != (d, m):
        wb = jnp.pad(wb, ((0, d_pad - d), (0, m_pad - m)))
    if n_pad != n:
        xs = jnp.pad(xs, ((0, n_pad - n), (0, 0)))
    if m_pad != m:
        ws = jnp.pad(ws, ((0, 0), (0, m_pad - m)))

    grid = (n_pad // tm, m_pad // tn, d_pad // tk)

    # Optional deeper pipelining for the (largest) weight DMA; sweep if
    # profiling shows exposed DMA on a short k loop.
    w_spec_kwargs = {}
    if w_buffers is not None:
        w_spec_kwargs["pipeline_mode"] = pl.Buffered(w_buffers)

    out = pl.pallas_call(
        _normed_linear_kernel,
        out_shape=jax.ShapeDtypeStruct((n_pad, m_pad), jnp.float32),
        grid_spec=pltpu.PrefetchScalarGridSpec(
            num_scalar_prefetch=0,
            grid=grid,
            in_specs=[
                pl.BlockSpec((tm, tk), lambda i, j, k: (i, k)),
                pl.BlockSpec((tk, tn), lambda i, j, k: (k, j), **w_spec_kwargs),
                pl.BlockSpec((tm, 1), lambda i, j, k: (i, 0)),   # row SoS
                pl.BlockSpec((1, tn), lambda i, j, k: (0, j)),   # col SoS
            ],
            out_specs=pl.BlockSpec((tm, tn), lambda i, j, k: (i, j)),
        ),
        compiler_params=pltpu.CompilerParams(
            # k MUST stay the innermost sequential ("arbitrary") axis; the
            # accumulate-into-o_ref pattern breaks if it is made parallel.
            dimension_semantics=("parallel", "parallel", "arbitrary"),
            vmem_limit_bytes=vmem_limit,
        ),
    )(xb, wb, xs, ws)

    return out[:n, :m]


def init_normed_linear_weight(key, in_features, out_features):
    """Deterministic replica of the PyTorch init:
    uniform_(-1, 1).renorm_(2, 1, 1e-5).mul_(1e5)
    (clamp each column's L2 norm to <= 1e-5, then scale by 1e5).
    """
    w = jax.random.uniform(
        key, (in_features, out_features), dtype=jnp.float32, minval=-1.0, maxval=1.0
    )
    col_norm = jnp.sqrt(jnp.sum(w * w, axis=0, keepdims=True))
    maxnorm = 1e-5
    scale = jnp.where(col_norm > maxnorm, maxnorm / (col_norm + 1e-7), 1.0)
    return w * scale * 1e5


def _reference(x, weight):
    xn = x / jnp.maximum(jnp.linalg.norm(x, axis=1, keepdims=True), _EPS)
    wn = weight / jnp.maximum(jnp.linalg.norm(weight, axis=0, keepdims=True), _EPS)
    return xn @ wn


if __name__ == "__main__":
    key = jax.random.PRNGKey(0)
    k_x1, k_w1, k_x2, k_w2 = jax.random.split(key, 4)

    # Case 1: tiny module-like shape (exercises padding / single-tile path).
    n1, d1, m1 = 8, 32, 16
    x1 = jax.random.normal(k_x1, (n1, d1), dtype=jnp.float32)
    w1 = init_normed_linear_weight(k_w1, d1, m1)
    out1 = jax.block_until_ready(normed_linear(x1, w1))
    ref1 = _reference(x1, w1)
    assert out1.shape == (n1, m1)
    assert jnp.allclose(out1, ref1, atol=2e-2, rtol=0.0), (
        float(jnp.max(jnp.abs(out1 - ref1)))
    )

    # Case 2: explicit small tiles to exercise the full (i, j, k) grid,
    # k-accumulation into o_ref and the finalize path.
    n2, d2, m2 = 32, 512, 256
    x2 = jax.random.normal(k_x2, (n2, d2), dtype=jnp.float32)
    w2 = init_normed_linear_weight(k_w2, d2, m2)
    out2 = jax.block_until_ready(normed_linear(x2, w2, tm=16, tn=128, tk=128))
    ref2 = _reference(x2, w2)
    assert out2.shape == (n2, m2)
    assert jnp.allclose(out2, ref2, atol=2e-2, rtol=0.0), (
        float(jnp.max(jnp.abs(out2 - ref2)))
    )

    # Case 3: same data through the auto-tile path (generation-aware defaults
    # + parallel-axis split).
    out3 = jax.block_until_ready(normed_linear(x2, w2))
    assert out3.shape == (n2, m2)
    assert jnp.allclose(out3, ref2, atol=2e-2, rtol=0.0), (
        float(jnp.max(jnp.abs(out3 - ref2)))
    )

    print("KERNEL_OK")
</pallas_src>

<mosaic_0001>
module attributes {stable_mosaic.version = 11 : i64} {
  func.func @_normed_linear_kernel(%arg0: i32, %arg1: i32, %arg2: i32, %arg3: memref<16x256xbf16, #tpu.memory_space<vmem>>, %arg4: memref<256x128xbf16, #tpu.memory_space<vmem>>, %arg5: memref<16x1xf32, #tpu.memory_space<vmem>>, %arg6: memref<1x128xf32, #tpu.memory_space<vmem>>, %arg7: memref<16x128xf32, #tpu.memory_space<vmem>>) attributes {dimension_semantics = [#tpu.dimension_semantics<parallel>, #tpu.dimension_semantics<parallel>, #tpu.dimension_semantics<arbitrary>], iteration_bounds = array<i64: 1, 1, 1>, scalar_prefetch = 0 : i64, scratch_operands = 0 : i64, tpu.core_type = #tpu.core_type<tc>, window_params = [{transform_indices = @transform_0, window_bounds = array<i64: 16, 256>}, {transform_indices = @transform_1, window_bounds = array<i64: 256, 128>}, {transform_indices = @transform_2, window_bounds = array<i64: 16, 1>}, {transform_indices = @transform_3, window_bounds = array<i64: 1, 128>}, {transform_indices = @transform_4, window_bounds = array<i64: 16, 128>}]} {
    %c0_i32 = arith.constant 0 : i32
    %0 = arith.cmpi eq, %arg2, %c0_i32 : i32
    %1 = arith.extui %0 : i1 to i32
    %c0_i32_0 = arith.constant 0 : i32
    %2 = arith.cmpi ne, %1, %c0_i32_0 : i32
    scf.if %2 {
      %cst_10 = arith.constant 0.000000e+00 : f32
      %12 = vector.broadcast %cst_10 : f32 to vector<16x128xf32>
      %c0_11 = arith.constant 0 : index
      %c0_12 = arith.constant 0 : index
      %13 = vector.load %arg7[%c0_11, %c0_12] : memref<16x128xf32, #tpu.memory_space<vmem>>, vector<16x128xf32>
      tpu.vector_store %arg7[%c0_11, %c0_12], %12 {strides = array<i32>} : memref<16x128xf32, #tpu.memory_space<vmem>>, vector<16x128xf32>,
    } else {
    }
    %c0 = arith.constant 0 : index
    %c0_1 = arith.constant 0 : index
    %3 = vector.load %arg7[%c0, %c0_1] : memref<16x128xf32, #tpu.memory_space<vmem>>, vector<16x128xf32>
    %c0_2 = arith.constant 0 : index
    %c0_3 = arith.constant 0 : index
    %4 = vector.load %arg3[%c0_2, %c0_3] : memref<16x256xbf16, #tpu.memory_space<vmem>>, vector<16x256xbf16>
    %c0_4 = arith.constant 0 : index
    %c0_5 = arith.constant 0 : index
    %5 = vector.load %arg4[%c0_4, %c0_5] : memref<256x128xbf16, #tpu.memory_space<vmem>>, vector<256x128xbf16>
    %cst = arith.constant dense<0.000000e+00> : vector<16x128xf32>
    %6 = tpu.matmul %4, %5, %cst {dimension_numbers = #tpu.dot_dimension_numbers<[1], [0], [0], [1], [0, 0, 1, 1], [], []>} : vector<16x256xbf16>, vector<256x128xbf16>, vector<16x128xf32> -> vector<16x128xf32>
    %7 = arith.addf %3, %6 : vector<16x128xf32>
    %c0_6 = arith.constant 0 : index
    %c0_7 = arith.constant 0 : index
    %8 = vector.load %arg7[%c0_6, %c0_7] : memref<16x128xf32, #tpu.memory_space<vmem>>, vector<16x128xf32>
    tpu.vector_store %arg7[%c0_6, %c0_7], %7 {strides = array<i32>} : memref<16x128xf32, #tpu.memory_space<vmem>>, vector<16x128xf32>,
    %c0_i32_8 = arith.constant 0 : i32
    %9 = arith.cmpi eq, %arg2, %c0_i32_8 : i32
    %10 = arith.extui %9 : i1 to i32
    %c0_i32_9 = arith.constant 0 : i32
    %11 = arith.cmpi ne, %10, %c0_i32_9 : i32
    scf.if %11 {
      %c0_10 = arith.constant 0 : index
      %c0_11 = arith.constant 0 : index
      %12 = vector.load %arg5[%c0_10, %c0_11] : memref<16x1xf32, #tpu.memory_space<vmem>>, vector<16x1xf32>
      %cst_12 = arith.constant 1.000000e-24 : f32
      %13 = vector.broadcast %cst_12 : f32 to vector<16x1xf32>
      %14 = arith.maximumf %12, %13 : vector<16x1xf32>
      %15 = math.rsqrt %14 : vector<16x1xf32>
      %c0_13 = arith.constant 0 : index
      %c0_14 = arith.constant 0 : index
      %16 = vector.load %arg6[%c0_13, %c0_14] : memref<1x128xf32, #tpu.memory_space<vmem>>, vector<1x128xf32>
      %cst_15 = arith.constant 1.000000e-24 : f32
      %17 = vector.broadcast %cst_15 : f32 to vector<1x128xf32>
      %18 = arith.maximumf %16, %17 : vector<1x128xf32>
      %19 = math.rsqrt %18 : vector<1x128xf32>
      %c0_16 = arith.constant 0 : index
      %c0_17 = arith.constant 0 : index
      %20 = vector.load %arg7[%c0_16, %c0_17] : memref<16x128xf32, #tpu.memory_space<vmem>>, vector<16x128xf32>
      %21 = vector.broadcast %15 : vector<16x1xf32> to vector<16x128xf32>
      %22 = arith.mulf %20, %21 : vector<16x128xf32>
      %23 = vector.broadcast %19 : vector<1x128xf32> to vector<16x128xf32>
      %24 = arith.mulf %22, %23 : vector<16x128xf32>
      %c0_18 = arith.constant 0 : index
      %c0_19 = arith.constant 0 : index
      %25 = vector.load %arg7[%c0_18, %c0_19] : memref<16x128xf32, #tpu.memory_space<vmem>>, vector<16x128xf32>
      tpu.vector_store %arg7[%c0_18, %c0_19], %24 {strides = array<i32>} : memref<16x128xf32, #tpu.memory_space<vmem>>, vector<16x128xf32>,
    } else {
    }
    return
  }
  func.func @transform_0(%arg0: i32, %arg1: i32, %arg2: i32) -> (i32, i32) {
    %c0_i32 = arith.constant 0 : i32
    return %arg0, %arg2 : i32, i32
  }
  func.func @transform_1(%arg0: i32, %arg1: i32, %arg2: i32) -> (i32, i32) {
    %c0_i32 = arith.constant 0 : i32
    return %arg2, %arg1 : i32, i32
  }
  func.func @transform_2(%arg0: i32, %arg1: i32, %arg2: i32) -> (i32, i32) {
    %c0_i32 = arith.constant 0 : i32
    %c0_i32_0 = arith.constant 0 : i32
    return %arg0, %c0_i32 : i32, i32
  }
  func.func @transform_3(%arg0: i32, %arg1: i32, %arg2: i32) -> (i32, i32) {
    %c0_i32 = arith.constant 0 : i32
    %c0_i32_0 = arith.constant 0 : i32
    return %c0_i32, %arg1 : i32, i32
  }
  func.func @transform_4(%arg0: i32, %arg1: i32, %arg2: i32) -> (i32, i32) {
    %c0_i32 = arith.constant 0 : i32
    return %arg0, %arg1 : i32, i32
  }
}

</mosaic_0001>

<bundles_post_ra>
// kernel: normed_linear.1
= control target key start
LH: loop header
LB: loop body
LE: loop exit
PB: predicated region body
PF: predicated region fallthrough
CT: control target
= control target key end

     0   :  { %v319_v1 = vmov 0   ;;  %v238_v27 = vlaneseq  ;;  %s414_s1 = inlined_call_operand.vmem [shape: bf16[256,128], index: 1, kind: input, shape index: {}]   ;;  %s415_s0 = inlined_call_operand.vmem [shape: bf16[16,256], index: 0, kind: input, shape index: {}]   ;;  %s416_s2 = inlined_call_operand.vmem [shape: f32[16,1], index: 2, kind: input, shape index: {}]   ;;  %s417_s3 = inlined_call_operand.vmem [shape: f32[1,128], index: 3, kind: input, shape index: {}]   ;;  %s418_s4 = inlined_call_operand.vmem [shape: f32[16,128], index: 4, kind: output, shape index: {}]  }
   0x1   :  { %v294_v0 = vld [vmem:[%s414_s1 + $0x40] sm:$0xff]   ;;  %293 = vset.pattern.permute.xlu0 %v319_v1  ;;  %v296_v3 = vld [vmem:[%s414_s1 + $0x48] sm:$0xff]   ;;  %v298_v5 = vld [vmem:[%s414_s1 + $0x50] sm:$0xff]  }
   0x2   :  { %v295_v2 = vld [vmem:[%s414_s1] sm:$0xff]   ;;  %269 = vmatprep.subr.bf16.mxu0 %v294_v0  ;;  %v297_v4 = vld [vmem:[%s414_s1 + $0x8] sm:$0xff]   ;;  %v299_v6 = vld [vmem:[%s414_s1 + $0x10] sm:$0xff]   ;;  %v239_v28 = vshrl.u32 %v238_v27, 7 }
   0x3   :  { %270 = vmatpush3.bf16.msra.mxu0 %v295_v2  ;;  %v300_v7 = vld [vmem:[%s414_s1 + $0x58] sm:$0xff]   ;;  %v302_v9 = vld [vmem:[%s414_s1 + $0x60] sm:$0xff]   ;;  %v304_v11 = vld [vmem:[%s414_s1 + $0x68] sm:$0xff]  }
   0x4   :  { %271 = vmatprep.subr.bf16.mxu0 %v296_v3  ;;  %v301_v8 = vld [vmem:[%s414_s1 + $0x18] sm:$0xff]   ;;  %v303_v10 = vld [vmem:[%s414_s1 + $0x20] sm:$0xff]   ;;  %v215_v14 = vld [vmem:[%s416_s2 + $0x8] sm:$0xff]  ;;  %v240_v30 = vsub.s32 0, %v239_v28 }
   0x5   :  { %v312_v12 = vld [vmem:[%s415_s0 + $0x4] ss:$8 sps:$4 sm:$0xff]   ;;  %v217_v16 = vmax.f32 %v215_v14, 1e-24  ;;  %v306_v18 = vld [vmem:[%s414_s1 + $0x70] sm:$0xff]   ;;  %v308_v20 = vld [vmem:[%s414_s1 + $0x78] sm:$0xff]  }
   0x6   :  { %v214_v13 = vld [vmem:[%s416_s2] sm:$0xff]  ;;  %v305_v17 = vld [vmem:[%s414_s1 + $0x28] sm:$0xff]   ;;  %198 = vmatprep.mubr.bf16.mxu0 %v312_v12  ;;  %v307_v19 = vld [vmem:[%s414_s1 + $0x30] sm:$0xff]  }
   0x7   :  { %272 = vmatpush3.bf16.msra.mxu0 %v297_v4  ;;  %v216_v15 = vmax.f32 %v214_v13, 1e-24  ;;  %v309_v21 = vld [vmem:[%s414_s1 + $0x38] sm:$0xff]   ;;  %v310_v23 = vld [vmem:[%s415_s0] ss:$8 sps:$4 sm:$0xff]  }
   0x8   :  { %273 = vmatprep.subr.bf16.mxu0 %v298_v5  ;;  %v220_v25 = vld [vmem:[%s417_s3] sm:$0x1] }
   0x9   :  { %313 = vrsqrt.f32 %v216_v15  ;;  %v221_v26 = vmax.f32 %v220_v25, 1e-24 }
   0xa   :  { %315 = vrsqrt.f32 %v217_v16 }
   0xb   :  { %274 = vmatpush3.bf16.msra.mxu0 %v299_v6  ;;  %317 = vrsqrt.f32 %v221_v26 }
   0xc   :  { %275 = vmatprep.subr.bf16.mxu0 %v300_v7 }
   0xf   :  { %276 = vmatpush3.bf16.msra.mxu0 %v301_v8 }
  0x10   :  { %277 = vmatprep.subr.bf16.mxu0 %v302_v9 }
  0x13   :  { %278 = vmatpush3.bf16.msra.mxu0 %v303_v10  ;;  %v314_v22 = vpop.eup %313 }
  0x14   :  { %279 = vmatprep.subr.bf16.mxu0 %v304_v11  ;;  %227 = vperm.xlu0 %293, %v314_v22   ;;  %v316_v24 = vpop.eup %315 }
  0x15   :  { %v318_v31 = vpop.eup %317 }
  0x16   :  { %v241_v38 = vrot.slane %v318_v31, %v240_v30 }
  0x17   :  { %280 = vmatpush3.bf16.msra.mxu0 %v305_v17 }
  0x18   :  { %281 = vmatprep.subr.bf16.mxu0 %v306_v18  ;;  %232 = vperm.xlu0 %293, %v316_v24  }
  0x1b   :  { %282 = vmatpush3.bf16.msra.mxu0 %v307_v19 }
  0x1c   :  { %283 = vmatprep.subr.bf16.mxu0 %v308_v20 }
  0x1f   :  { %284 = vmatpush3.bf16.msra.mxu0 %v309_v21 }
  0x22   :  { %199 = vmatmul.mubr.bf16.vlgmr.msra.gmra.mrb[0].mxu0 %v310_v23 }
  0x93   :  { %v228_v33 = vpop.permute.xlu0 %227 }
  0x97   :  { %v233_v40 = vpop.permute.xlu0 %232 }
  0xf5   :  { %v285_v29 = vpop.f32.mrb[0].mxu0 }
  0xf6   :  { %v286_v32 = vpop.f32.mrb[1].mxu0 }
  0xf7   :  { %v287_v34 = vadd.f32 %v286_v32, %v285_v29  ;;  %v288_v35 = vpop.f32.mrb[2].mxu0 }
  0xf8   :  { %v289_v36 = vpop.f32.mrb[3].mxu0 }
  0xf9   :  { %v290_v37 = vadd.f32 %v289_v36, %v288_v35  ;;  %v235_v39 = vmul.f32 %v287_v34, %v228_v33 }
  0xfb   :  { %v243_v41 = vmul.f32 %v241_v38, %v235_v39  ;;  %v236_v42 = vmul.f32 %v290_v37, %v233_v40 }
  0xfd   :  { %245 = vst [vmem:[%s418_s4] sm:$0xff] %v243_v41  ;;  %v244_v43 = vmul.f32 %v241_v38, %v236_v42 }
  0xff   :  { %246 = vst [vmem:[%s418_s4 + $0x8] sm:$0xff] %v244_v43 }

</bundles_post_ra>
